<compile_context>
chip_gen: v7x
topology: tpu7x:2x2x1
jax: 0.10.0
libtpu: 0.0.40
codegen_flags: <defaults>
</compile_context>

<pallas_src>
import jax
import jax.numpy as jnp
from jax.experimental import pallas as pl
from jax.experimental.pallas import tpu as pltpu


_SUBLANE = 8               # f32 sublane width (batch/second-to-last dim)
_GRID_FREE_MAX_BATCH = 256 # batches up to this (rounded to 8) -> grid-free call
_TB_TARGET = 1024          # target rows per batch tile in the gridded path


def _round_up(n, m):
    return ((n + m - 1) // m) * m


def _cdiv(a, b):
    return -(-a // b)


def _make_fused_kernel(n_hebb, n_fcn):
    """Whole SemiHebbNet forward in one kernel.

    Ref order: x, hebb_w[0..n_hebb-1], fcn_w[0..n_fcn-1], fcn_b[0..n_fcn-1],
               fcn_out, hebb_out.
    Weights are pre-transposed to [in, out]; feature dims are true-width
    (no padding) -- Mosaic pads the small matmuls to MXU tiles internally and
    only true-width bytes are read/written from/to HBM.
    """

    def kernel(*refs):
        idx = 0
        x_ref = refs[idx]; idx += 1
        hebb_w = refs[idx:idx + n_hebb]; idx += n_hebb
        fcn_w = refs[idx:idx + n_fcn]; idx += n_fcn
        fcn_b = refs[idx:idx + n_fcn]; idx += n_fcn
        fcn_out_ref = refs[idx]
        hebb_out_ref = refs[idx + 1]

        # --- HebbNet: relu(x @ W) per layer, no bias ---
        h = x_ref[...]
        for w_ref in hebb_w:
            h = jnp.maximum(
                jnp.dot(h, w_ref[...], preferred_element_type=jnp.float32),
                0.0)
        hebb_out_ref[...] = h.astype(hebb_out_ref.dtype)

        # --- FCN: x @ W + b, ReLU between hidden layers only ---
        y = h
        for i in range(n_fcn):
            y = jnp.dot(y, fcn_w[i][...], preferred_element_type=jnp.float32)
            y = y + fcn_b[i][...]
            if i < n_fcn - 1:
                y = jnp.maximum(y, 0.0)
        fcn_out_ref[...] = y.astype(fcn_out_ref.dtype)

    return kernel


def prepare_semihebbnet_params(hebb_weights, fcn_weights, fcn_biases):
    """One-time parameter prep (hoisted out of the per-call forward).

    PyTorch stores Linear weights as [out, in]; transpose to [in, out] so the
    kernel computes a plain `x @ W`, and make biases 2-D (1, out) for a clean
    sublane broadcast. No feature padding. Call once and reuse the result.
    """
    hebb_wt = tuple(jnp.transpose(jnp.asarray(w, jnp.float32))
                    for w in hebb_weights)
    fcn_wt = tuple(jnp.transpose(jnp.asarray(w, jnp.float32))
                   for w in fcn_weights)
    fcn_bp = tuple(jnp.asarray(b, jnp.float32).reshape(1, -1)
                   for b in fcn_biases)
    return hebb_wt, fcn_wt, fcn_bp


@jax.jit
def semihebbnet_forward(x, hebb_wt, fcn_wt, fcn_bp):
    """Returns (FCN(HebbNet(x)), HebbNet(x)), computed in one Pallas kernel.

    `hebb_wt` / `fcn_wt` / `fcn_bp` must come from prepare_semihebbnet_params.
    """
    B, d_in = x.shape
    n_hebb = len(hebb_wt)
    n_fcn = len(fcn_wt)
    d_hebb_out = hebb_wt[-1].shape[1] if n_hebb else d_in
    d_fcn_out = fcn_wt[-1].shape[1]

    x = x.astype(jnp.float32)
    kernel = _make_fused_kernel(n_hebb, n_fcn)
    vmem = pl.BlockSpec(memory_space=pltpu.MemorySpace.VMEM)
    n_params = n_hebb + 2 * n_fcn

    b8 = _round_up(B, _SUBLANE)

    if b8 <= _GRID_FREE_MAX_BATCH:
        # Small batch: single grid-free invocation, everything VMEM-resident.
        b_pad = b8
        x_p = jnp.pad(x, ((0, b_pad - B), (0, 0))) if b_pad != B else x
        out_shape = (
            jax.ShapeDtypeStruct((b_pad, d_fcn_out), x.dtype),
            jax.ShapeDtypeStruct((b_pad, d_hebb_out), x.dtype),
        )
        fcn_out, hebb_out = pl.pallas_call(
            kernel,
            out_shape=out_shape,
            in_specs=[vmem] * (1 + n_params),
            out_specs=(vmem, vmem),
        )(x_p, *hebb_wt, *fcn_wt, *fcn_bp)
    else:
        # Gridded path: >= 2 'parallel' batch tiles (v7x 2-TC / megacore),
        # tile adapted to the batch so tb divides b_pad and at most
        # 8*grid - 1 junk rows are padded/streamed.
        grid_n = max(2, _cdiv(b8, _TB_TARGET))
        tb = _round_up(_cdiv(b8, grid_n), _SUBLANE)
        b_pad = tb * grid_n
        x_p = jnp.pad(x, ((0, b_pad - B), (0, 0))) if b_pad != B else x
        out_shape = (
            jax.ShapeDtypeStruct((b_pad, d_fcn_out), x.dtype),
            jax.ShapeDtypeStruct((b_pad, d_hebb_out), x.dtype),
        )
        in_specs = [pl.BlockSpec((tb, d_in), lambda i: (i, 0))]
        # Weights/biases: non-pipelined whole-array VMEM residents.
        in_specs += [vmem] * n_params
        out_specs = (
            pl.BlockSpec((tb, d_fcn_out), lambda i: (i, 0)),
            pl.BlockSpec((tb, d_hebb_out), lambda i: (i, 0)),
        )
        fcn_out, hebb_out = pl.pallas_call(
            kernel,
            out_shape=out_shape,
            grid=(grid_n,),
            in_specs=in_specs,
            out_specs=out_specs,
            compiler_params=pltpu.CompilerParams(
                dimension_semantics=("parallel",)),
        )(x_p, *hebb_wt, *fcn_wt, *fcn_bp)

    # Outputs are already true feature width; slice only the batch dim, and
    # only when padding was actually added.
    if b_pad != B:
        fcn_out = fcn_out[:B]
        hebb_out = hebb_out[:B]
    return fcn_out, hebb_out


def _init_linear(key, fan_out, fan_in, with_bias):
    # deterministic PyTorch-like uniform(-1/sqrt(fan_in), 1/sqrt(fan_in)) init
    kw, kb = jax.random.split(key)
    bound = 1.0 / jnp.sqrt(jnp.float32(fan_in))
    W = jax.random.uniform(kw, (fan_out, fan_in), jnp.float32, -bound, bound)
    if with_bias:
        b = jax.random.uniform(kb, (fan_out,), jnp.float32, -bound, bound)
        return W, b
    return W, None


def _reference(x, hebb_weights, fcn_weights, fcn_biases):
    h = x
    for W in hebb_weights:
        h = jnp.maximum(h @ W.T, 0.0)
    o = h
    for i, (W, b) in enumerate(zip(fcn_weights, fcn_biases)):
        o = o @ W.T + b
        if i < len(fcn_weights) - 1:
            o = jnp.maximum(o, 0.0)
    return o, h


if __name__ == "__main__":
    key = jax.random.PRNGKey(0)

    hebb_layer_sizes = [16, 32]        # HebbNet([16, 32], ...)
    fcn_layer_sizes = [32, 64, 10]     # FCN([32, 64, 10], activation=ReLU)

    keys = jax.random.split(key, 8)
    k_iter = iter(keys)

    # HebbNet weights (no bias)
    hebb_weights = []
    for i in range(len(hebb_layer_sizes) - 1):
        W, _ = _init_linear(next(k_iter),
                            hebb_layer_sizes[i + 1], hebb_layer_sizes[i],
                            with_bias=False)
        hebb_weights.append(W)

    # FCN weights + biases
    fcn_weights, fcn_biases = [], []
    for i in range(len(fcn_layer_sizes) - 1):
        W, b = _init_linear(next(k_iter),
                            fcn_layer_sizes[i + 1], fcn_layer_sizes[i],
                            with_bias=True)
        fcn_weights.append(W)
        fcn_biases.append(b)

    hebb_weights = tuple(hebb_weights)
    fcn_weights = tuple(fcn_weights)
    fcn_biases = tuple(fcn_biases)

    # One-time parameter prep (hoisted out of the per-call forward).
    hebb_wt, fcn_wt, fcn_bp = prepare_semihebbnet_params(
        hebb_weights, fcn_weights, fcn_biases)
    jax.block_until_ready((hebb_wt, fcn_wt, fcn_bp))

    # --- test 1: small batch (grid-free fused kernel, no padding at all) ---
    batch = 8
    x = jax.random.normal(next(k_iter), (batch, hebb_layer_sizes[0]),
                          jnp.float32)
    out, hebb_out = semihebbnet_forward(x, hebb_wt, fcn_wt, fcn_bp)
    jax.block_until_ready((out, hebb_out))

    o_ref, h_ref = _reference(x, hebb_weights, fcn_weights, fcn_biases)
    assert out.shape == (batch, fcn_layer_sizes[-1])
    assert hebb_out.shape == (batch, hebb_layer_sizes[-1])
    assert jnp.allclose(out, o_ref, atol=1e-5, rtol=1e-5)
    assert jnp.allclose(hebb_out, h_ref, atol=1e-5, rtol=1e-5)

    # --- test 2: larger batch (batch-tiled 'parallel' grid, adapted tile) ---
    big_batch = 520   # -> grid of 2 'parallel' steps, tb=264, 8 padded rows
    xb = jax.random.normal(next(k_iter), (big_batch, hebb_layer_sizes[0]),
                           jnp.float32)
    out_b, hebb_out_b = semihebbnet_forward(xb, hebb_wt, fcn_wt, fcn_bp)
    jax.block_until_ready((out_b, hebb_out_b))

    o_ref_b, h_ref_b = _reference(xb, hebb_weights, fcn_weights, fcn_biases)
    assert out_b.shape == (big_batch, fcn_layer_sizes[-1])
    assert hebb_out_b.shape == (big_batch, hebb_layer_sizes[-1])
    assert jnp.allclose(out_b, o_ref_b, atol=1e-5, rtol=1e-5)
    assert jnp.allclose(hebb_out_b, h_ref_b, atol=1e-5, rtol=1e-5)

    print("KERNEL_OK")
</pallas_src>

<mosaic_0001>
module attributes {stable_mosaic.version = 11 : i64} {
  func.func @kernel(%arg0: memref<8x16xf32, #tpu.memory_space<vmem>>, %arg1: memref<16x32xf32, #tpu.memory_space<vmem>>, %arg2: memref<32x64xf32, #tpu.memory_space<vmem>>, %arg3: memref<64x10xf32, #tpu.memory_space<vmem>>, %arg4: memref<1x64xf32, #tpu.memory_space<vmem>>, %arg5: memref<1x10xf32, #tpu.memory_space<vmem>>, %arg6: memref<8x10xf32, #tpu.memory_space<vmem>>, %arg7: memref<8x32xf32, #tpu.memory_space<vmem>>) attributes {dimension_semantics = [], scalar_prefetch = 0 : i64, scratch_operands = 0 : i64, tpu.core_type = #tpu.core_type<tc>} {
    %c0 = arith.constant 0 : index
    %c0_0 = arith.constant 0 : index
    %0 = vector.load %arg0[%c0, %c0_0] : memref<8x16xf32, #tpu.memory_space<vmem>>, vector<8x16xf32>
    %c0_1 = arith.constant 0 : index
    %c0_2 = arith.constant 0 : index
    %1 = vector.load %arg1[%c0_1, %c0_2] : memref<16x32xf32, #tpu.memory_space<vmem>>, vector<16x32xf32>
    %cst = arith.constant dense<0.000000e+00> : vector<8x32xf32>
    %2 = tpu.matmul %0, %1, %cst {dimension_numbers = #tpu.dot_dimension_numbers<[1], [0], [0], [1], [0, 0, 1, 1], [], []>} : vector<8x16xf32>, vector<16x32xf32>, vector<8x32xf32> -> vector<8x32xf32>
    %cst_3 = arith.constant 0.000000e+00 : f32
    %3 = vector.broadcast %cst_3 : f32 to vector<8x32xf32>
    %4 = arith.maximumf %2, %3 : vector<8x32xf32>
    %c0_4 = arith.constant 0 : index
    %c0_5 = arith.constant 0 : index
    %5 = vector.load %arg7[%c0_4, %c0_5] : memref<8x32xf32, #tpu.memory_space<vmem>>, vector<8x32xf32>
    tpu.vector_store %arg7[%c0_4, %c0_5], %4 {strides = array<i32>} : memref<8x32xf32, #tpu.memory_space<vmem>>, vector<8x32xf32>,
    %c0_6 = arith.constant 0 : index
    %c0_7 = arith.constant 0 : index
    %6 = vector.load %arg2[%c0_6, %c0_7] : memref<32x64xf32, #tpu.memory_space<vmem>>, vector<32x64xf32>
    %cst_8 = arith.constant dense<0.000000e+00> : vector<8x64xf32>
    %7 = tpu.matmul %4, %6, %cst_8 {dimension_numbers = #tpu.dot_dimension_numbers<[1], [0], [0], [1], [0, 0, 1, 1], [], []>} : vector<8x32xf32>, vector<32x64xf32>, vector<8x64xf32> -> vector<8x64xf32>
    %c0_9 = arith.constant 0 : index
    %c0_10 = arith.constant 0 : index
    %8 = vector.load %arg4[%c0_9, %c0_10] : memref<1x64xf32, #tpu.memory_space<vmem>>, vector<1x64xf32>
    %9 = vector.broadcast %8 : vector<1x64xf32> to vector<8x64xf32>
    %10 = arith.addf %7, %9 : vector<8x64xf32>
    %cst_11 = arith.constant 0.000000e+00 : f32
    %11 = vector.broadcast %cst_11 : f32 to vector<8x64xf32>
    %12 = arith.maximumf %10, %11 : vector<8x64xf32>
    %c0_12 = arith.constant 0 : index
    %c0_13 = arith.constant 0 : index
    %13 = vector.load %arg3[%c0_12, %c0_13] : memref<64x10xf32, #tpu.memory_space<vmem>>, vector<64x10xf32>
    %cst_14 = arith.constant dense<0.000000e+00> : vector<8x10xf32>
    %14 = tpu.matmul %12, %13, %cst_14 {dimension_numbers = #tpu.dot_dimension_numbers<[1], [0], [0], [1], [0, 0, 1, 1], [], []>} : vector<8x64xf32>, vector<64x10xf32>, vector<8x10xf32> -> vector<8x10xf32>
    %c0_15 = arith.constant 0 : index
    %c0_16 = arith.constant 0 : index
    %15 = vector.load %arg5[%c0_15, %c0_16] : memref<1x10xf32, #tpu.memory_space<vmem>>, vector<1x10xf32>
    %16 = vector.broadcast %15 : vector<1x10xf32> to vector<8x10xf32>
    %17 = arith.addf %14, %16 : vector<8x10xf32>
    %c0_17 = arith.constant 0 : index
    %c0_18 = arith.constant 0 : index
    %18 = vector.load %arg6[%c0_17, %c0_18] : memref<8x10xf32, #tpu.memory_space<vmem>>, vector<8x10xf32>
    tpu.vector_store %arg6[%c0_17, %c0_18], %17 {strides = array<i32>} : memref<8x10xf32, #tpu.memory_space<vmem>>, vector<8x10xf32>,
    return
  }
}

</mosaic_0001>

<bundles_post_ra>
// kernel: semihebbnet_forward.1
= control target key start
LH: loop header
LB: loop body
LE: loop exit
PB: predicated region body
PF: predicated region fallthrough
CT: control target
= control target key end

     0   :  { %13 = vsyncpa [#allocation3], 0  ;;  %v444_v2 = vmov 0.0|0.0   ;;  %vm445_vm0 = vmmov 0   ;;  %v446_v4 = vmov 0.0   ;;  %s564_s0 = inlined_call_operand.vmem [shape: f32[8,16], index: 0, kind: input, shape index: {}]   ;;  %s565_s1 = inlined_call_operand.vmem [shape: f32[16,32], index: 1, kind: input, shape index: {}]   ;;  %s566_s2 = inlined_call_operand.vmem [shape: f32[32,64], index: 2, kind: input, shape index: {}]   ;;  %s567_s3 = inlined_call_operand.vmem [shape: f32[64,10], index: 3, kind: input, shape index: {}]   ;;  %s568_s4 = inlined_call_operand.vmem [shape: f32[1,64], index: 4, kind: input, shape index: {}]   ;;  %s569_s5 = inlined_call_operand.vmem [shape: f32[1,10], index: 5, kind: input, shape index: {}]   ;;  %s570_s6 = inlined_call_operand.hbm [shape: f32[8,10], index: 6, kind: output, shape index: {0}]   ;;  %s571_s7 = inlined_call_operand.hbm [shape: f32[8,32], index: 7, kind: output, shape index: {1}]  }
   0x1   :  { %v28_v0 = vld [vmem:[%s565_s1] sm:$0xff]  ;;  %v29_v1 = vld [vmem:[%s565_s1 + $0x8] sm:$0xff]  ;;  %370 = vmatprep.subr.bf16.mxu1 %v444_v2  ;;  %337 = vmatprep.mubr.msk.f32.mxu1 %vm445_vm0, %v446_v4 }
   0x2   :  { %v371_v3 = vpack.c.bf16 %v29_v1, %v28_v0  ;;  %v107_v5 = vld [vmem:[%s566_s2] sm:$0xff]  ;;  %v108_v6 = vld [vmem:[%s566_s2 + $0x8] sm:$0xff] }
   0x3   :  { %14 = vsyncpa [#allocation5], 0  ;;  %379 = vmatprep.subr.bf16.mxu0 %v444_v2  ;;  %367 = vmatprep.mubr.msk.f32.mxu0 %vm445_vm0, %v446_v4  ;;  %v27_v7 = vld [vmem:[%s564_s0] sm:$0xff]  ;;  %vm30_vm1 = vcmask 130048   ;;  %v374_v8 = vpack.c.bf16 %v108_v6, %v107_v5  ;;  %v109_v9 = vld [vmem:[%s566_s2 + $0x10] sm:$0xff]  ;;  %vm105_vm2 = vcmask 261120  }
   0x4   :  { %372 = vmatpush3.bf16.msra.mxu1 %v371_v3  ;;  %v110_v10 = vld [vmem:[%s566_s2 + $0x18] sm:$0xff]  ;;  %v192_v12 = vld [vmem:[%s567_s3] sm:$0xff]  ;;  %v193_v13 = vld [vmem:[%s567_s3 + $0x8] sm:$0xff]  ;;  %vm207_vm3 = vcmask 523264   ;;  %s447_s30 = smov [#allocation4]  }
   0x5   :  { %373 = vmatprep.subr.bf16.mxu1 %v444_v2  ;;  %v377_v11 = vpack.c.bf16 %v110_v10, %v109_v9  ;;  %v194_v14 = vld [vmem:[%s567_s3 + $0x10] sm:$0xff]  ;;  %v380_v15 = vpack.c.bf16 %v193_v13, %v192_v12  ;;  %v195_v16 = vld [vmem:[%s567_s3 + $0x18] sm:$0xff]  ;;  %v196_v18 = vld [vmem:[%s567_s3 + $0x20] sm:$0xff]  ;;  %s299_s8 = sshll.u32 %s447_s30, 4  ;;  %s300_s8 = int_to_ptr.vmem [resolvable:$true] %s299_s8 }
   0x6   :  { %v383_v17 = vpack.c.bf16 %v195_v16, %v194_v14  ;;  %v197_v19 = vld [vmem:[%s567_s3 + $0x28] sm:$0xff]  ;;  %v198_v24 = vld [vmem:[%s567_s3 + $0x30] sm:$0xff]  ;;  %v199_v25 = vld [vmem:[%s567_s3 + $0x38] sm:$0xff]  ;;  %s396_s9 = scalar_lea.vmem %s300_s8, 128  ;;  %p401_p1 = scmp.lt.s32.totalorder %s300_s8, %s300_s8 }
   0x7   :  { %338 = vmatmul.mubr.msk.f32.vlgmr.msra.gmra.mrb[0].mxu1 %vm30_vm1, %v27_v7  ;;  %381 = vmatpush3.bf16.msra.mxu0 %v380_v15  ;;  %v386_v20 = vpack.c.bf16 %v197_v19, %v196_v18  ;;  %v389_v26 = vpack.c.bf16 %v199_v25, %v198_v24  ;;  %v312_v27 = vld [vmem:[%s568_s4] ss:$0 sm:$0xff]  ;;  %p397_p0 = scmp.ne.s32.totalorder %s300_s8, %s396_s9  ;;  %p402_p2 = scmp.lt.s32.totalorder %s396_s9, %s396_s9 }
   0x8   :  { %375 = vmatpush3.bf16.msra.mxu1 %v374_v8  ;;  %348 = vmatprep.mubr.msk.f32.mxu1 %vm445_vm0, %v446_v4 }
   0x9   :  { %376 = vmatprep.subr.bf16.mxu1 %v444_v2  ;;  %382 = vmatprep.subr.bf16.mxu0 %v444_v2  ;;  %p403_p3 = por %p402_p2, %p401_p1 }
   0xb   :  { %384 = vmatpush3.bf16.msra.mxu0 %v383_v17  ;;  %p404_p4 = pnand %p403_p3, %p397_p0 }
   0xc   :  { %378 = vmatpush3.bf16.msra.mxu1 %v377_v11  ;;  %385 = vmatprep.subr.bf16.mxu0 %v444_v2 }
   0xf   :  { %387 = vmatpush3.bf16.msra.mxu0 %v386_v20 }
  0x10   :  { %388 = vmatprep.subr.bf16.mxu0 %v444_v2 }
  0x13   :  { %390 = vmatpush3.bf16.msra.mxu0 %v389_v26 }
  0xda   :  { %v100_v21 = vpop.f32.mrb[0].mxu1 }
  0xdb   :  { %v104_v22 = vmax.f32 %v100_v21, 0.0  ;;  %v339_v23 = vpop.f32.mrb[1].mxu1 }
  0xdd   :  { %349 = vmatmul.mubr.msk.f32.vlgmr.msra.gmra.mrb[2].mxu1 %vm105_vm2, %v104_v22  ;;  %106 = vst.msk [vmem:[#allocation4] sm:$0xff] %vm105_vm2, %v104_v22 }
 0x1b0   :  { %v187_v28 = vpop.f32.mrb[2].mxu1 }
 0x1b1   :  { %v188_v29 = vadd.f32 %v312_v27, %v187_v28  ;;  %v350_v30 = vpop.f32.mrb[3].mxu1 }
 0x1b3   :  { %v191_v31 = vmax.f32 %v188_v29, 0.0 }
 0x1b5   :  { %368 = vmatmul.mubr.msk.f32.vlgmr.msra.gmra.mrb[0].mxu0 %vm207_vm3, %v191_v31 }
 0x1b6   :  { %407 = shalt.err (!%p404_p4)
}
 0x1b7   :  { %s408_s4 = scalar_lea.hbm %s571_s7, 128 }
 0x1b8   :  { %p409_p5 = scmp.ne.s32.totalorder %s571_s7, %s408_s4  ;;  %p412_p6 = scmp.lt.u32.totalorder %s408_s4, %s571_s7 }
 0x1ba   :  { %p414_p7 = pnand %p412_p6, %p409_p5 }
 0x1bc   :  { %417 = shalt.err (!%p414_p7)
}
 0x1bd   :  { %302 = dma.vmem_to_hbm [thread:$0]  %s300_s8, 128, %s571_s7, [#allocation5]   ;;  %v314_v32 = vld [vmem:[%s569_s5] ss:$0 sm:$0xff]  ;;  %vm281_vm4 = vcmask 80896  }
 0x1be   :  { %s448_s17 = smov [#allocation2]  }
 0x1bf   :  { %s289_s18 = sshll.u32 %s448_s17, 4  ;;  %s290_s18 = int_to_ptr.vmem [resolvable:$true] %s289_s18 }
 0x1c0   :  { %s418_s19 = scalar_lea.vmem %s290_s18, 128  ;;  %p423_p9 = scmp.lt.s32.totalorder %s290_s18, %s290_s18 }
 0x1c1   :  { %p419_p8 = scmp.ne.s32.totalorder %s290_s18, %s418_s19  ;;  %p424_p10 = scmp.lt.s32.totalorder %s418_s19, %s418_s19 }
 0x1c3   :  { %p425_p11 = por %p424_p10, %p423_p9 }
 0x1c5   :  { %p426_p12 = pnand %p425_p11, %p419_p8 }
 0x288   :  { %v277_v33 = vpop.f32.mrb[0].mxu0 }
 0x289   :  { %v278_v34 = vadd.f32 %v314_v32, %v277_v33  ;;  %v369_v35 = vpop.f32.mrb[1].mxu0 }
 0x28b   :  { %282 = vst.msk [vmem:[#allocation2] sm:$0xff] %vm281_vm4, %v278_v34 }
 0x28c   :  { %429 = shalt.err (!%p426_p12)
}
 0x28d   :  { %s430_s2 = scalar_lea.hbm %s570_s6, 128 }
 0x28e   :  { %p431_p13 = scmp.ne.s32.totalorder %s570_s6, %s430_s2  ;;  %p434_p0 = scmp.lt.u32.totalorder %s430_s2, %s570_s6 }
 0x290   :  { %p436_p1 = pnand %p434_p0, %p431_p13 }
 0x292   :  { %439 = shalt.err (!%p436_p1)
}
 0x293   :  { %292 = dma.vmem_to_hbm [thread:$0]  %s290_s18, 128, %s570_s6, [#allocation3]  }
 0x294   :  { %440 = dma.done.wait [#allocation3], 128  }
 0x295   :  { %441 = vsyncadd [#allocation3], 4294967168 }
 0x296   :  { %442 = dma.done.wait [#allocation5], 128  }
 0x297   :  { %443 = vsyncadd [#allocation5], 4294967168 }
 0x298   :  { %309 = vsyncpa [#allocation3], 1 }
 0x299   :  { %310 = vsyncpa [#allocation5], 1 }

</bundles_post_ra>
